<compile_context>
chip_gen: v7x
topology: tpu7x:2x2x1
jax: 0.10.0
libtpu: 0.0.40
codegen_flags: <defaults>
</compile_context>

<pallas_src>
import functools
import itertools

import jax
import jax.numpy as jnp
import numpy as np
from jax.experimental import pallas as pl
from jax.experimental.pallas import tpu as pltpu


def _round_up(x, m):
    return ((x + m - 1) // m) * m


# ----------------------------------------------------------------------------------
# Pallas kernel: per-row softmax + target-column gather (one-hot matmul) + scaling
# ----------------------------------------------------------------------------------
def _cost_kernel(logits_ref, onehot_ref, out_ref, *, cost_class):
    # logits_ref: (TILE_N, C_pad) f32   onehot_ref: (C_pad, T_pad) bf16
    # out_ref   : (TILE_N, T_pad) f32
    logits = logits_ref[...].astype(jnp.float32)

    # numerically-stable exp (un-normalized softmax)
    m = jnp.max(logits, axis=-1, keepdims=True)
    e = jnp.exp(logits - m)                                    # (TILE_N, C_pad) f32
    s = jnp.sum(e, axis=-1, keepdims=True)                     # (TILE_N, 1)     f32

    # column gather at tgt_ids as a lane-dense MXU matmul (bf16 operands, f32 acc);
    # the one-hot is exact in bf16, only `e` sees bf16 rounding.
    gathered = jnp.dot(e.astype(jnp.bfloat16), onehot_ref[...],
                       preferred_element_type=jnp.float32)     # (TILE_N, T_pad)

    # Fold the softmax normalization and -cost_class into one multiply; the
    # reciprocal goes to the EUP (free bundle slot).
    inv_s = pl.reciprocal(s, approx=True)
    out_ref[...] = gathered * ((-cost_class) * inv_s)


def compute_cost_matrix(pred_logits, tgt_ids, cost_class=1.0, *, max_tile_n=512):
    """pred_logits: (bs, nq, num_classes); tgt_ids: (T,) int.
    Returns the cost matrix (bs, nq, T) float32 (== C.view(bs, nq, -1) in the ref)."""
    bs, nq, n_classes = pred_logits.shape
    t = int(tgt_ids.shape[0])
    n = bs * nq
    if t == 0:
        return jnp.zeros((bs, nq, 0), dtype=jnp.float32)

    # lane-dense padding (multiples of 128 on the lane axis, 8 on the sublane axis)
    c_pad = _round_up(n_classes, 128)
    t_pad = _round_up(t, 128)
    tile_n = min(max_tile_n, _round_up(n, 8))
    n_pad = _round_up(n, tile_n)

    logits_flat = pred_logits.reshape(n, n_classes).astype(jnp.float32)
    # pad classes/rows with a very negative logit -> exp ~= 0, softmax unchanged
    logits_padded = jnp.pad(
        logits_flat, ((0, n_pad - n), (0, c_pad - n_classes)), constant_values=-1e9)

    # loop-invariant one-hot gather matrix, built once outside the kernel.
    # padded target columns use sentinel -1 -> all-zero columns (sliced off later).
    tgt_padded = jnp.pad(tgt_ids.astype(jnp.int32), (0, t_pad - t),
                         constant_values=-1)
    class_ids = jnp.arange(c_pad, dtype=jnp.int32)[:, None]                 # (C_pad, 1)
    onehot = (class_ids == tgt_padded[None, :]).astype(jnp.bfloat16)        # (C_pad, T_pad)

    kernel = functools.partial(_cost_kernel, cost_class=float(cost_class))
    c_full = pl.pallas_call(
        kernel,
        out_shape=jax.ShapeDtypeStruct((n_pad, t_pad), jnp.float32),
        grid=(n_pad // tile_n,),
        in_specs=[
            pl.BlockSpec((tile_n, c_pad), lambda i: (i, 0)),   # row tiles, pipelined
            pl.BlockSpec((c_pad, t_pad), lambda i: (0, 0)),    # resident across tiles
        ],
        out_specs=pl.BlockSpec((tile_n, t_pad), lambda i: (i, 0)),
        compiler_params=pltpu.CompilerParams(
            dimension_semantics=("parallel",)),                # v7x: shard across TCs
    )(logits_padded, onehot)

    return c_full[:n, :t].reshape(bs, nq, t)


# ----------------------------------------------------------------------------------
# Host-side linear sum assignment (O(n^2 m) shortest augmenting path, numpy)
# TODO(synk): Hungarian assignment is a sequential combinatorial algorithm; it stays
# on host (numpy) rather than inside a Pallas kernel.
# ----------------------------------------------------------------------------------
def _linear_sum_assignment(cost):
    """Matches scipy.optimize.linear_sum_assignment semantics:
    returns (row_ind, col_ind), row_ind sorted, len = min(n_rows, n_cols)."""
    cost = np.asarray(cost, dtype=np.float64)
    if cost.size == 0:
        return (np.empty(0, dtype=np.int64), np.empty(0, dtype=np.int64))

    transposed = cost.shape[0] > cost.shape[1]
    if transposed:
        cost = cost.T
    n, m = cost.shape                     # n <= m

    u = np.zeros(n + 1)
    v = np.zeros(m + 1)
    p = np.zeros(m + 1, dtype=np.int64)   # p[j] = 1-based row matched to column j (0 = free)
    way = np.zeros(m + 1, dtype=np.int64)

    for i in range(1, n + 1):
        p[0] = i
        j0 = 0
        minv = np.full(m + 1, np.inf)
        used = np.zeros(m + 1, dtype=bool)
        while True:
            used[j0] = True
            i0 = p[j0]
            free = ~used[1:]
            cur = cost[i0 - 1, :] - u[i0] - v[1:]
            better = free & (cur < minv[1:])
            minv[1:] = np.where(better, cur, minv[1:])
            way[1:] = np.where(better, j0, way[1:])
            masked = np.where(free, minv[1:], np.inf)
            j1 = int(np.argmin(masked)) + 1
            delta = masked[j1 - 1]
            u[p[used]] += delta
            v[used] -= delta
            minv[~used] -= delta
            j0 = j1
            if p[j0] == 0:
                break
        # augment along the alternating path
        while j0 != 0:
            j1 = way[j0]
            p[j0] = p[j1]
            j0 = j1

    cols = np.nonzero(p[1:] != 0)[0]
    rows = p[1:][cols] - 1
    if transposed:
        rows, cols = cols, rows
    order = np.argsort(rows, kind="stable")
    return rows[order].astype(np.int64), cols[order].astype(np.int64)


class HungarianMatcherV2Pallas:
    def __init__(self, cost_class: float = 1.0):
        assert cost_class != 0, "all costs cant be 0"
        self.cost_class = cost_class

    def __call__(self, outputs, targets):
        pred_logits = outputs["pred_logits"]                  # (bs, nq, num_classes)
        bs, nq, _ = pred_logits.shape
        sizes = [int(v["labels"].shape[0]) for v in targets]

        if sum(sizes) == 0:
            e = np.empty(0, dtype=np.int64)
            return [(e.copy(), e.copy()) for _ in range(bs)]

        tgt_ids = jnp.concatenate([v["labels"] for v in targets], axis=0)

        # Pallas hot path: cost matrix
        C = compute_cost_matrix(pred_logits, tgt_ids, self.cost_class)
        C = np.asarray(jax.block_until_ready(C))              # (bs, nq, total_targets)

        indices = []
        offset = 0
        for i, sz in enumerate(sizes):
            c_i = C[i, :, offset:offset + sz]
            offset += sz
            row, col = _linear_sum_assignment(c_i)
            indices.append((row, col))
        return indices


# ----------------------------------------------------------------------------------
# Demo / self-check
# ----------------------------------------------------------------------------------
def _brute_force_min_cost(cost):
    cost = np.asarray(cost, dtype=np.float64)
    n_rows, n_cols = cost.shape
    if n_cols > n_rows:
        cost = cost.T
        n_rows, n_cols = cost.shape
    best = np.inf
    for perm in itertools.permutations(range(n_rows), n_cols):
        best = min(best, sum(cost[perm[j], j] for j in range(n_cols)))
    return best


if __name__ == "__main__":
    key = jax.random.PRNGKey(0)
    bs, num_queries, num_classes = 2, 8, 32
    sizes = [3, 4]

    k_logits, k_lab = jax.random.split(key)
    pred_logits = jax.random.normal(k_logits, (bs, num_queries, num_classes),
                                    dtype=jnp.float32)
    pred_boxes = jnp.zeros((bs, num_queries, 4), dtype=jnp.float32)  # unused by cost

    lab_keys = jax.random.split(k_lab, bs)
    targets = []
    for i, sz in enumerate(sizes):
        labels = jax.random.randint(lab_keys[i], (sz,), 0, num_classes - 1,
                                    dtype=jnp.int32)
        boxes = jnp.zeros((sz, 4), dtype=jnp.float32)
        targets.append({"labels": labels, "boxes": boxes})

    matcher = HungarianMatcherV2Pallas(cost_class=1.0)
    indices = matcher({"pred_logits": pred_logits, "pred_boxes": pred_boxes}, targets)

    # --- sanity 1: kernel cost matrix vs pure-JAX reference ---
    tgt_ids = jnp.concatenate([t["labels"] for t in targets], axis=0)
    C_kernel = np.asarray(jax.block_until_ready(
        compute_cost_matrix(pred_logits, tgt_ids, 1.0)))
    probs = jax.nn.softmax(pred_logits.reshape(bs * num_queries, num_classes), axis=-1)
    C_ref = np.asarray(-probs[:, np.asarray(tgt_ids)]).reshape(bs, num_queries, -1)
    np.testing.assert_allclose(C_kernel, C_ref, rtol=2e-2, atol=1e-3)

    # --- sanity 2: one pair per batch element, correct lengths, optimal cost ---
    assert len(indices) == bs
    offset = 0
    for b, ((ri, ci), sz) in enumerate(zip(indices, sizes)):
        assert len(ri) == len(ci) == min(num_queries, sz)
        c_b = C_ref[b, :, offset:offset + sz]
        offset += sz
        achieved = float(sum(c_b[r, c] for r, c in zip(ri, ci)))
        optimal = _brute_force_min_cost(c_b)
        assert np.isclose(achieved, optimal, rtol=1e-4, atol=1e-4), (achieved, optimal)

    print("KERNEL_OK")
</pallas_src>

<mosaic_0001>
module attributes {stable_mosaic.version = 11 : i64} {
  func.func @_cost_kernel(%arg0: i32, %arg1: memref<16x128xf32, #tpu.memory_space<vmem>>, %arg2: memref<128x128xbf16, #tpu.memory_space<vmem>>, %arg3: memref<16x128xf32, #tpu.memory_space<vmem>>) attributes {dimension_semantics = [#tpu.dimension_semantics<parallel>], iteration_bounds = array<i64: 1>, scalar_prefetch = 0 : i64, scratch_operands = 0 : i64, tpu.core_type = #tpu.core_type<tc>, window_params = [{transform_indices = @transform_0, window_bounds = array<i64: 16, 128>}, {pipeline_mode = #tpu.pipeline_mode<synchronous>, transform_indices = @transform_1, window_bounds = array<i64: 128, 128>}, {transform_indices = @transform_2, window_bounds = array<i64: 16, 128>}]} {
    %c0 = arith.constant 0 : index
    %c0_0 = arith.constant 0 : index
    %0 = vector.load %arg1[%c0, %c0_0] : memref<16x128xf32, #tpu.memory_space<vmem>>, vector<16x128xf32>
    %cst = arith.constant dense<0xFF800000> : vector<16xf32>
    %1 = vector.multi_reduction <maximumf>, %0, %cst [1] : vector<16x128xf32> to vector<16xf32>
    %2 = vector.shape_cast %1 : vector<16xf32> to vector<16x1xf32>
    %3 = vector.broadcast %2 : vector<16x1xf32> to vector<16x128xf32>
    %4 = arith.subf %0, %3 : vector<16x128xf32>
    %5 = math.exp %4 : vector<16x128xf32>
    %cst_1 = arith.constant dense<0.000000e+00> : vector<16xf32>
    %6 = vector.multi_reduction <add>, %5, %cst_1 [1] : vector<16x128xf32> to vector<16xf32>
    %7 = vector.shape_cast %6 : vector<16xf32> to vector<16x1xf32>
    %8 = arith.truncf %5 : vector<16x128xf32> to vector<16x128xbf16>
    %c0_2 = arith.constant 0 : index
    %c0_3 = arith.constant 0 : index
    %9 = vector.load %arg2[%c0_2, %c0_3] : memref<128x128xbf16, #tpu.memory_space<vmem>>, vector<128x128xbf16>
    %cst_4 = arith.constant dense<0.000000e+00> : vector<16x128xf32>
    %10 = tpu.matmul %8, %9, %cst_4 {dimension_numbers = #tpu.dot_dimension_numbers<[1], [0], [0], [1], [0, 0, 1, 1], [], []>} : vector<16x128xbf16>, vector<128x128xbf16>, vector<16x128xf32> -> vector<16x128xf32>
    %11 = tpu.reciprocal %7 {approx = true} : vector<16x1xf32> -> vector<16x1xf32>
    %cst_5 = arith.constant -1.000000e+00 : f32
    %12 = vector.broadcast %cst_5 : f32 to vector<16x1xf32>
    %13 = arith.mulf %12, %11 : vector<16x1xf32>
    %14 = vector.broadcast %13 : vector<16x1xf32> to vector<16x128xf32>
    %15 = arith.mulf %10, %14 : vector<16x128xf32>
    %c0_6 = arith.constant 0 : index
    %c0_7 = arith.constant 0 : index
    %16 = vector.load %arg3[%c0_6, %c0_7] : memref<16x128xf32, #tpu.memory_space<vmem>>, vector<16x128xf32>
    tpu.vector_store %arg3[%c0_6, %c0_7], %15 {strides = array<i32>} : memref<16x128xf32, #tpu.memory_space<vmem>>, vector<16x128xf32>,
    return
  }
  func.func @transform_0(%arg0: i32) -> (i32, i32) {
    %c0_i32 = arith.constant 0 : i32
    %c0_i32_0 = arith.constant 0 : i32
    return %arg0, %c0_i32 : i32, i32
  }
  func.func @transform_1(%arg0: i32) -> (i32, i32) {
    %c0_i32 = arith.constant 0 : i32
    %c0_i32_0 = arith.constant 0 : i32
    %c0_i32_1 = arith.constant 0 : i32
    return %c0_i32, %c0_i32_0 : i32, i32
  }
  func.func @transform_2(%arg0: i32) -> (i32, i32) {
    %c0_i32 = arith.constant 0 : i32
    %c0_i32_0 = arith.constant 0 : i32
    return %arg0, %c0_i32 : i32, i32
  }
}

</mosaic_0001>

<bundles_post_ra>
// kernel: tpu_custom_call.1
= control target key start
LH: loop header
LB: loop body
LE: loop exit
PB: predicated region body
PF: predicated region fallthrough
CT: control target
= control target key end

     0   :  { %7 = vsyncpa [#allocation3], 0  ;;  %s389_s0 = inlined_call_operand.hbm [shape: f32[16,128], index: 0, kind: input, shape index: {}]   ;;  %s390_s1 = inlined_call_operand.hbm [shape: bf16[128,128], index: 1, kind: input, shape index: {}]   ;;  %s391_s2 = inlined_call_operand.hbm [shape: f32[16,128], index: 2, kind: output, shape index: {}]  }
   0x1   :  { %8 = vsyncpa [#allocation6], 0 }
   0x2   :  { %9 = vsyncpa [#allocation4], 0  ;;  %s323_s9 = smov [#allocation2]   ;;  %s251_s13 = scalar_lea.hbm %s389_s0, 256 }
   0x3   :  { %s15_s10 = sshll.u32 %s323_s9, 4  ;;  %p252_p0 = scmp.ne.s32.totalorder %s389_s0, %s251_s13  ;;  %s16_s10 = int_to_ptr.vmem [resolvable:$true] %s15_s10 }
   0x4   :  { %p255_p1 = scmp.lt.u32.totalorder %s251_s13, %s389_s0 }
   0x6   :  { %p257_p2 = pnand %p255_p1, %p252_p0 }
   0x8   :  { %260 = shalt.err (!%p257_p2)
}
   0x9   :  { %s261_s18 = scalar_lea.vmem %s16_s10, 256  ;;  %p266_p4 = scmp.lt.s32.totalorder %s16_s10, %s16_s10 }
   0xa   :  { %p262_p3 = scmp.ne.s32.totalorder %s16_s10, %s261_s18  ;;  %p267_p5 = scmp.lt.s32.totalorder %s261_s18, %s261_s18 }
   0xc   :  { %p268_p6 = por %p267_p5, %p266_p4 }
   0xe   :  { %p269_p7 = pnand %p268_p6, %p262_p3 }
  0x10   :  { %272 = shalt.err (!%p269_p7)
}
  0x11   :  { %s324_s19 = smov 128   ;;  %s325_s20 = smov 8  }
  0x12   :  { %21 = dma.hbm_to_vmem [thread:$0]  %s389_s0, 256, %s16_s10, [#allocation3], %s324_s19, %s324_s19, %s325_s20  }
  0x13   :  { %s326_s23 = smov [#allocation5]   ;;  %s273_s27 = scalar_lea.hbm %s390_s1, 1024 }
  0x14   :  { %s27_s24 = sshll.u32 %s326_s23, 4  ;;  %p274_p8 = scmp.ne.s32.totalorder %s390_s1, %s273_s27  ;;  %s28_s24 = int_to_ptr.vmem [resolvable:$true] %s27_s24 }
  0x15   :  { %p277_p9 = scmp.lt.u32.totalorder %s273_s27, %s390_s1 }
  0x17   :  { %p279_p10 = pnand %p277_p9, %p274_p8 }
  0x19   :  { %282 = shalt.err (!%p279_p10)
}
  0x1a   :  { %s283_s4 = scalar_lea.vmem %s28_s24, 1024  ;;  %p288_p12 = scmp.lt.s32.totalorder %s28_s24, %s28_s24 }
  0x1b   :  { %p284_p11 = scmp.ne.s32.totalorder %s28_s24, %s283_s4  ;;  %p289_p13 = scmp.lt.s32.totalorder %s283_s4, %s283_s4 }
  0x1d   :  { %p290_p0 = por %p289_p13, %p288_p12 }
  0x1f   :  { %p291_p1 = pnand %p290_p0, %p284_p11 }
  0x21   :  { %294 = shalt.err (!%p291_p1)
}
  0x22   :  { %s327_s0 = smov 64   ;;  %s328_s5 = smov 4  }
  0x23   :  { %33 = dma.hbm_to_vmem [thread:$0]  %s390_s1, 1024, %s28_s24, [#allocation6], %s327_s0, %s327_s0, %s328_s5  }
  0x24   :  { %317 = dma.done.wait [#allocation3], 256  }
  0x25   :  { %318 = vsyncadd [#allocation3], 4294967040 }
  0x26   :  { %319 = dma.done.wait [#allocation6], 1024  }
  0x27   :  { %320 = vsyncadd [#allocation6], 4294966272  ;;  %v329_v0 = vmov 0.0   ;;  %v41_v1 = vld [vmem:[#allocation2] sm:$0xff]  ;;  %v235_v2 = vld [vmem:[#allocation5] sm:$0xff]   ;;  %vm330_vm0 = vmmov 0  }
  0x28   :  { %206 = vmatprep.subr.bf16.mxu0 %v329_v0  ;;  %43 = vmax.xlane.f32.xlu0 %v41_v1  ;;  %v42_v3 = vld [vmem:[#allocation2 + $0x8] sm:$0xff]  ;;  %v236_v4 = vld [vmem:[#allocation5 + $0x8] sm:$0xff]   ;;  %v237_v5 = vld [vmem:[#allocation5 + $0x10] sm:$0xff]   ;;  %s331_s1 = smov [#allocation7]  }
  0x29   :  { %207 = vmatpush3.bf16.msra.mxu0 %v235_v2  ;;  %v238_v6 = vld [vmem:[#allocation5 + $0x18] sm:$0xff]   ;;  %v239_v7 = vld [vmem:[#allocation5 + $0x20] sm:$0xff]   ;;  %v240_v8 = vld [vmem:[#allocation5 + $0x28] sm:$0xff]   ;;  %222 = vmatprep.mubr.msk.bf16.mxu0 %vm330_vm0, %v329_v0  ;;  %s176_s8 = sshll.u32 %s331_s1, 4  ;;  %s177_s8 = int_to_ptr.vmem [resolvable:$true] %s176_s8 }
  0x2a   :  { %208 = vmatprep.subr.bf16.mxu0 %v329_v0  ;;  %v241_v9 = vld [vmem:[#allocation5 + $0x30] sm:$0xff]   ;;  %v242_v10 = vld [vmem:[#allocation5 + $0x38] sm:$0xff]   ;;  %s295_s9 = scalar_lea.vmem %s177_s8, 256  ;;  %p300_p3 = scmp.lt.s32.totalorder %s177_s8, %s177_s8 }
  0x2b   :  { %p296_p2 = scmp.ne.s32.totalorder %s177_s8, %s295_s9  ;;  %p301_p4 = scmp.lt.s32.totalorder %s295_s9, %s295_s9 }
  0x2c   :  { %45 = vmax.xlane.f32.xlu0 %v42_v3 }
  0x2d   :  { %209 = vmatpush3.bf16.msra.mxu0 %v236_v4  ;;  %p302_p5 = por %p301_p4, %p300_p3 }
  0x2e   :  { %210 = vmatprep.subr.bf16.mxu0 %v329_v0 }
  0x2f   :  { %p303_p6 = pnand %p302_p5, %p296_p2 }
  0x31   :  { %211 = vmatpush3.bf16.msra.mxu0 %v237_v5 }
  0x32   :  { %212 = vmatprep.subr.bf16.mxu0 %v329_v0 }
  0x35   :  { %213 = vmatpush3.bf16.msra.mxu0 %v238_v6 }
  0x36   :  { %214 = vmatprep.subr.bf16.mxu0 %v329_v0 }
  0x39   :  { %215 = vmatpush3.bf16.msra.mxu0 %v239_v7 }
  0x3a   :  { %216 = vmatprep.subr.bf16.mxu0 %v329_v0 }
  0x3d   :  { %217 = vmatpush3.bf16.msra.mxu0 %v240_v8 }
  0x3e   :  { %218 = vmatprep.subr.bf16.mxu0 %v329_v0 }
  0x41   :  { %219 = vmatpush3.bf16.msra.mxu0 %v241_v9 }
  0x42   :  { %220 = vmatprep.subr.bf16.mxu0 %v329_v0 }
  0x45   :  { %221 = vmatpush3.bf16.msra.mxu0 %v242_v10 }
  0xb5   :  { %v44_v11 = vpop.xlane.xlu0 %43 }
  0xb6   :  { %v47_v12 = vsub.f32 %v41_v1, %v44_v11 }
  0xb8   :  { %v49_v13 = vmul.f32 1.442695, %v47_v12 }
  0xb9   :  { %v46_v14 = vpop.xlane.xlu0 %45 }
  0xba   :  { %243 = vpow2.f32 %v49_v13  ;;  %v48_v15 = vsub.f32 %v42_v3, %v46_v14 }
  0xbc   :  { %v51_v16 = vmul.f32 1.442695, %v48_v15 }
  0xbe   :  { %245 = vpow2.f32 %v51_v16 }
  0xc4   :  { %v244_v17 = vpop.eup %243 }
  0xc5   :  { %53 = vadd.xlane.f32.xlu1 %v244_v17 }
  0xc8   :  { %v246_v18 = vpop.eup %245 }
  0xc9   :  { %55 = vadd.xlane.f32.xlu1 %v246_v18  ;;  %v57_v19 = vpack.c.bf16 %v246_v18, %v244_v17 }
  0xcb   :  { %223 = vmatmul.mubr.bf16.vlgmr.msra.gmra.mrb[0].mxu0 %v57_v19 }
 0x152   :  { %v54_v20 = vpop.xlane.xlu1 %53 }
 0x153   :  { %247 = vrcp.f32 %v54_v20 }
 0x156   :  { %v56_v21 = vpop.xlane.xlu1 %55 }
 0x157   :  { %249 = vrcp.f32 %v56_v21 }
 0x15d   :  { %v248_v22 = vpop.eup %247 }
 0x15e   :  { %v165_v24 = vmul.f32 -1.0, %v248_v22 }
 0x161   :  { %v250_v23 = vpop.eup %249 }
 0x162   :  { %v166_v28 = vmul.f32 -1.0, %v250_v23 }
 0x19e   :  { %v156_v25 = vpop.f32.mrb[0].mxu0 }
 0x19f   :  { %v167_v26 = vmul.f32 %v165_v24, %v156_v25  ;;  %v224_v27 = vpop.f32.mrb[1].mxu0 }
 0x1a0   :  { %v159_v29 = vpop.f32.mrb[2].mxu0 }
 0x1a1   :  { %169 = vst [vmem:[#allocation7] sm:$0xff] %v167_v26  ;;  %v168_v30 = vmul.f32 %v166_v28, %v159_v29  ;;  %v225_v31 = vpop.f32.mrb[3].mxu0 }
 0x1a3   :  { %170 = vst [vmem:[#allocation7 + $0x8] sm:$0xff] %v168_v30 }
 0x1a4   :  { %306 = shalt.err (!%p303_p6)
}
 0x1a5   :  { %s307_s12 = scalar_lea.hbm %s391_s2, 256 }
 0x1a6   :  { %p308_p7 = scmp.ne.s32.totalorder %s391_s2, %s307_s12  ;;  %p311_p8 = scmp.lt.u32.totalorder %s307_s12, %s391_s2 }
 0x1a8   :  { %p313_p9 = pnand %p311_p8, %p308_p7 }
 0x1aa   :  { %316 = shalt.err (!%p313_p9)
}
 0x1ab   :  { %182 = dma.vmem_to_hbm [thread:$0]  %s177_s8, 256, %s391_s2, [#allocation4], %s324_s19, %s324_s19, %s325_s20  }
 0x1ac   :  { %321 = dma.done.wait [#allocation4], 256  }
 0x1ad   :  { %322 = vsyncadd [#allocation4], 4294967040 }
 0x1ae   :  { %186 = vsyncpa [#allocation3], 1 }
 0x1af   :  { %187 = vsyncpa [#allocation6], 1 }
 0x1b0   :  { %188 = vsyncpa [#allocation4], 1 }

</bundles_post_ra>
